<compile_context>
chip_gen: v7x
topology: tpu7x:2x2x1
jax: 0.10.0
libtpu: 0.0.40
codegen_flags: <defaults>
</compile_context>

<pallas_src>
import functools

import jax
import jax.numpy as jnp
from jax.experimental import pallas as pl
from jax.experimental.pallas import tpu as pltpu


# ----------------------------------------------------------------------------
# Pallas kernel
# ----------------------------------------------------------------------------
def _bifpn_add3_kernel(w_ref, x0_ref, x1_ref, x2_ref, o_ref, *, eps):
    # w_ref : (3,) RAW fusion weights (f32) in SMEM.
    # x*_ref: (1, tr, lane) input tiles in VMEM.
    # o_ref : (1, 3, tr, lane) output tile; axis 1 is the concat slot, so the
    #         (B, 3, rows, lane) output reshapes for free to (B, 3*C, H, W).
    w0 = w_ref[0]
    w1 = w_ref[1]
    w2 = w_ref[2]
    inv = 1.0 / (w0 + w1 + w2 + eps)          # scalar slot; effectively free
    o_ref[0, 0, :, :] = (x0_ref[0, :, :] * (w0 * inv)).astype(o_ref.dtype)
    o_ref[0, 1, :, :] = (x1_ref[0, :, :] * (w1 * inv)).astype(o_ref.dtype)
    o_ref[0, 2, :, :] = (x2_ref[0, :, :] * (w2 * inv)).astype(o_ref.dtype)


# ----------------------------------------------------------------------------
# wrapper
# ----------------------------------------------------------------------------
def bifpn_add3(w, x0, x1, x2, *, eps=1e-4,
               vmem_budget_bytes=32 << 20,      # double-buffered working set
               vmem_limit_bytes=48 << 20):      # < 64 MiB (v7x physical VMEM)
    """Fused BiFPN_Add3 forward: cat([w0*x0, w1*x1, w2*x2], axis=1), NCHW."""
    assert x0.shape == x1.shape == x2.shape
    assert x0.dtype == x1.dtype == x2.dtype
    B, C, H, W = x0.shape
    N = C * H * W
    in_dtype = x0.dtype
    # Match PyTorch promotion: f32 weights * bf16/f16 input -> f32 output.
    out_dtype = jnp.promote_types(jnp.float32, in_dtype)

    # ---- layout: flatten C*H*W onto a lane-dense (rows, 128) factoring ----
    if N % 128 == 0:
        lane, rows = 128, N // 128          # dense, unmasked 128-lane stores
    else:
        lane, rows = H * W, C               # rare fallback; still correct
        # TODO(synk): pad-free handling of N % 128 != 0 keeps masked stores.

    x0r = x0.reshape(B, rows, lane)         # free row-major reshapes
    x1r = x1.reshape(B, rows, lane)
    x2r = x2.reshape(B, rows, lane)

    # ---- row tile sized against the VMEM working-set budget ----
    in_b = jnp.dtype(in_dtype).itemsize
    out_b = jnp.dtype(out_dtype).itemsize
    # per row: 3 input rows + 3 output rows, double buffered.
    bytes_per_row = 2 * 3 * lane * (in_b + out_b)
    tr = min(rows, max(1, vmem_budget_bytes // bytes_per_row))
    if tr < rows:
        # Partial blocks must be 8-sublane aligned; max(8, .) only exceeds the
        # budget for pathological lane widths and stays under vmem_limit.
        tr = max(8, (tr // 8) * 8)
    nr = pl.cdiv(rows, tr)
    if B * nr < 2 and rows >= 16:
        # Keep >= 2 parallel grid steps so both v7x TensorCores get work.
        tr = max(8, ((pl.cdiv(rows, 2) + 7) // 8) * 8)
        nr = pl.cdiv(rows, tr)

    w32 = w.astype(jnp.float32)

    out = pl.pallas_call(
        functools.partial(_bifpn_add3_kernel, eps=float(eps)),
        grid=(B, nr),
        in_specs=[
            pl.BlockSpec(memory_space=pltpu.MemorySpace.SMEM),      # raw w (3,)
            pl.BlockSpec((1, tr, lane), lambda b, r: (b, r, 0)),    # x0 tile
            pl.BlockSpec((1, tr, lane), lambda b, r: (b, r, 0)),    # x1 tile
            pl.BlockSpec((1, tr, lane), lambda b, r: (b, r, 0)),    # x2 tile
        ],
        out_specs=pl.BlockSpec((1, 3, tr, lane), lambda b, r: (b, 0, r, 0)),
        out_shape=jax.ShapeDtypeStruct((B, 3, rows, lane), out_dtype),
        compiler_params=pltpu.CompilerParams(
            dimension_semantics=("parallel", "parallel"),
            vmem_limit_bytes=vmem_limit_bytes),
    )(w32, x0r, x1r, x2r)

    # (B, 3, rows, lane) -> (B, 3*C, H, W): free reshape == the channel concat.
    return out.reshape(B, 3 * C, H, W)


# ----------------------------------------------------------------------------
# pure-JAX reference (verification only)
# ----------------------------------------------------------------------------
def reference_forward(w, xs, *, eps=1e-4, d=1):
    weight = w / (jnp.sum(w) + eps)
    return jnp.concatenate(
        [weight[0] * xs[0], weight[1] * xs[1], weight[2] * xs[2]], axis=d)


if __name__ == "__main__":
    key = jax.random.PRNGKey(0)
    k_w, k0, k1, k2 = jax.random.split(key, 4)
    B, C, H, W = 2, 4, 16, 16

    # The module initializes w = ones(3); perturb so the weighting is non-trivial.
    w = jnp.ones((3,), jnp.float32) + 0.1 * jax.random.normal(k_w, (3,), jnp.float32)
    x0 = jax.random.normal(k0, (B, C, H, W), jnp.float32)
    x1 = jax.random.normal(k1, (B, C, H, W), jnp.float32)
    x2 = jax.random.normal(k2, (B, C, H, W), jnp.float32)

    fwd = jax.jit(bifpn_add3)
    out = jax.block_until_ready(fwd(w, x0, x1, x2))
    ref = jax.block_until_ready(reference_forward(w, [x0, x1, x2]))

    assert out.shape == (B, 3 * C, H, W), out.shape
    assert jnp.allclose(out, ref, atol=1e-5, rtol=1e-5), \
        float(jnp.max(jnp.abs(out - ref)))
    print("KERNEL_OK")
</pallas_src>

<mosaic_0001>
module attributes {stable_mosaic.version = 11 : i64} {
  func.func @_bifpn_add3_kernel(%arg0: i32, %arg1: i32, %arg2: memref<3xf32, #tpu.memory_space<smem>>, %arg3: memref<1x8x128xf32, #tpu.memory_space<vmem>>, %arg4: memref<1x8x128xf32, #tpu.memory_space<vmem>>, %arg5: memref<1x8x128xf32, #tpu.memory_space<vmem>>, %arg6: memref<1x3x8x128xf32, #tpu.memory_space<vmem>>) attributes {dimension_semantics = [#tpu.dimension_semantics<parallel>, #tpu.dimension_semantics<parallel>], iteration_bounds = array<i64: 2, 1>, scalar_prefetch = 0 : i64, scratch_operands = 0 : i64, tpu.core_type = #tpu.core_type<tc>, window_params = [{transform_indices = @transform_0, window_bounds = array<i64: 3>}, {transform_indices = @transform_1, window_bounds = array<i64: 1, 8, 128>}, {transform_indices = @transform_2, window_bounds = array<i64: 1, 8, 128>}, {transform_indices = @transform_3, window_bounds = array<i64: 1, 8, 128>}, {transform_indices = @transform_4, window_bounds = array<i64: 1, 3, 8, 128>}]} {
    %c0 = arith.constant 0 : index
    %0 = memref.load %arg2[%c0] : memref<3xf32, #tpu.memory_space<smem>>
    %c1 = arith.constant 1 : index
    %1 = memref.load %arg2[%c1] : memref<3xf32, #tpu.memory_space<smem>>
    %c2 = arith.constant 2 : index
    %2 = memref.load %arg2[%c2] : memref<3xf32, #tpu.memory_space<smem>>
    %3 = arith.addf %0, %1 : f32
    %4 = arith.addf %3, %2 : f32
    %cst = arith.constant 9.99999974E-5 : f32
    %5 = arith.addf %4, %cst : f32
    %cst_0 = arith.constant 1.000000e+00 : f32
    %6 = arith.divf %cst_0, %5 : f32
    %c0_1 = arith.constant 0 : index
    %c0_2 = arith.constant 0 : index
    %c0_3 = arith.constant 0 : index
    %7 = vector.load %arg3[%c0_1, %c0_2, %c0_3] : memref<1x8x128xf32, #tpu.memory_space<vmem>>, vector<1x8x128xf32>
    %8 = vector.shape_cast %7 : vector<1x8x128xf32> to vector<8x128xf32>
    %9 = arith.mulf %0, %6 : f32
    %10 = vector.broadcast %9 : f32 to vector<8x128xf32>
    %11 = arith.mulf %8, %10 : vector<8x128xf32>
    %c0_4 = arith.constant 0 : index
    %c0_5 = arith.constant 0 : index
    %c0_6 = arith.constant 0 : index
    %c0_7 = arith.constant 0 : index
    %12 = vector.load %arg6[%c0_4, %c0_5, %c0_6, %c0_7] : memref<1x3x8x128xf32, #tpu.memory_space<vmem>>, vector<1x1x8x128xf32>
    %13 = vector.shape_cast %12 : vector<1x1x8x128xf32> to vector<8x128xf32>
    %14 = vector.shape_cast %11 : vector<8x128xf32> to vector<1x1x8x128xf32>
    tpu.vector_store %arg6[%c0_4, %c0_5, %c0_6, %c0_7], %14 {strides = array<i32>} : memref<1x3x8x128xf32, #tpu.memory_space<vmem>>, vector<1x1x8x128xf32>,
    %c0_8 = arith.constant 0 : index
    %c0_9 = arith.constant 0 : index
    %c0_10 = arith.constant 0 : index
    %15 = vector.load %arg4[%c0_8, %c0_9, %c0_10] : memref<1x8x128xf32, #tpu.memory_space<vmem>>, vector<1x8x128xf32>
    %16 = vector.shape_cast %15 : vector<1x8x128xf32> to vector<8x128xf32>
    %17 = arith.mulf %1, %6 : f32
    %18 = vector.broadcast %17 : f32 to vector<8x128xf32>
    %19 = arith.mulf %16, %18 : vector<8x128xf32>
    %c0_11 = arith.constant 0 : index
    %c1_12 = arith.constant 1 : index
    %c0_13 = arith.constant 0 : index
    %c0_14 = arith.constant 0 : index
    %20 = vector.load %arg6[%c0_11, %c1_12, %c0_13, %c0_14] : memref<1x3x8x128xf32, #tpu.memory_space<vmem>>, vector<1x1x8x128xf32>
    %21 = vector.shape_cast %20 : vector<1x1x8x128xf32> to vector<8x128xf32>
    %22 = vector.shape_cast %19 : vector<8x128xf32> to vector<1x1x8x128xf32>
    tpu.vector_store %arg6[%c0_11, %c1_12, %c0_13, %c0_14], %22 {strides = array<i32>} : memref<1x3x8x128xf32, #tpu.memory_space<vmem>>, vector<1x1x8x128xf32>,
    %c0_15 = arith.constant 0 : index
    %c0_16 = arith.constant 0 : index
    %c0_17 = arith.constant 0 : index
    %23 = vector.load %arg5[%c0_15, %c0_16, %c0_17] : memref<1x8x128xf32, #tpu.memory_space<vmem>>, vector<1x8x128xf32>
    %24 = vector.shape_cast %23 : vector<1x8x128xf32> to vector<8x128xf32>
    %25 = arith.mulf %2, %6 : f32
    %26 = vector.broadcast %25 : f32 to vector<8x128xf32>
    %27 = arith.mulf %24, %26 : vector<8x128xf32>
    %c0_18 = arith.constant 0 : index
    %c2_19 = arith.constant 2 : index
    %c0_20 = arith.constant 0 : index
    %c0_21 = arith.constant 0 : index
    %28 = vector.load %arg6[%c0_18, %c2_19, %c0_20, %c0_21] : memref<1x3x8x128xf32, #tpu.memory_space<vmem>>, vector<1x1x8x128xf32>
    %29 = vector.shape_cast %28 : vector<1x1x8x128xf32> to vector<8x128xf32>
    %30 = vector.shape_cast %27 : vector<8x128xf32> to vector<1x1x8x128xf32>
    tpu.vector_store %arg6[%c0_18, %c2_19, %c0_20, %c0_21], %30 {strides = array<i32>} : memref<1x3x8x128xf32, #tpu.memory_space<vmem>>, vector<1x1x8x128xf32>,
    return
  }
  func.func @transform_0(%arg0: i32, %arg1: i32) -> i32 {
    %c0_i32 = arith.constant 0 : i32
    %c0_i32_0 = arith.constant 0 : i32
    return %c0_i32 : i32
  }
  func.func @transform_1(%arg0: i32, %arg1: i32) -> (i32, i32, i32) {
    %c0_i32 = arith.constant 0 : i32
    %c0_i32_0 = arith.constant 0 : i32
    return %arg0, %arg1, %c0_i32 : i32, i32, i32
  }
  func.func @transform_2(%arg0: i32, %arg1: i32) -> (i32, i32, i32) {
    %c0_i32 = arith.constant 0 : i32
    %c0_i32_0 = arith.constant 0 : i32
    return %arg0, %arg1, %c0_i32 : i32, i32, i32
  }
  func.func @transform_3(%arg0: i32, %arg1: i32) -> (i32, i32, i32) {
    %c0_i32 = arith.constant 0 : i32
    %c0_i32_0 = arith.constant 0 : i32
    return %arg0, %arg1, %c0_i32 : i32, i32, i32
  }
  func.func @transform_4(%arg0: i32, %arg1: i32) -> (i32, i32, i32, i32) {
    %c0_i32 = arith.constant 0 : i32
    %c0_i32_0 = arith.constant 0 : i32
    %c0_i32_1 = arith.constant 0 : i32
    return %arg0, %c0_i32, %arg1, %c0_i32_0 : i32, i32, i32, i32
  }
}

</mosaic_0001>

<bundles_post_ra>
// kernel: bifpn_add3.1
= control target key start
LH: loop header
LB: loop body
LE: loop exit
PB: predicated region body
PF: predicated region fallthrough
CT: control target
= control target key end

     0   :  { %9 = vsyncpa [#allocation3], 0  ;;  %s571_s15 = smov 0   ;;  %s573_s16 = smov 0   ;;  %s636_s0 = inlined_call_operand.vmem [shape: f32[3], index: 0, kind: input, shape index: {}]   ;;  %s637_s1 = inlined_call_operand.vmem [shape: f32[2,8,128], index: 1, kind: input, shape index: {}]   ;;  %s638_s2 = inlined_call_operand.vmem [shape: f32[2,8,128], index: 2, kind: input, shape index: {}]   ;;  %s639_s3 = inlined_call_operand.vmem [shape: f32[2,8,128], index: 3, kind: input, shape index: {}]   ;;  %s640_s4 = inlined_call_operand.vmem [shape: f32[2,3,8,128], index: 4, kind: output, shape index: {}]  }
   0x1   :  { %s575_s17 = smov 0  }
   0x2 LB: > { %s445_s18 = sadd.s32 4294967295, %s543_s17   ;;  %s27_s19 = sadd.s32 1, %s539_s16  ;;  %s543_s17 = sphi %s575_s17, %s15_s17   ;;  %s539_s16 = sphi %s573_s16, %s644_s16   ;;  %s535_s15 = sphi %s571_s15, %s643_s15  }
   0x3   : > { %p29_p0 = scmp.ge.s32.totalorder %s27_s19, 2  ;;  %p447_p1 = scmp.ge.s32.totalorder %s543_s17, 1 }
   0x4   : > { %p165_p2 = scmp.lt.s32.totalorder %s543_s17, 3  ;;  %p596_p4 = scmp.eq.s32.totalorder %s445_s18, 0 }
   0x5   : > { %s646_s19 = smov (%p29_p0, %s27_s19), 0  ;;  %s178_s24 = sshll.u32 %s636_s0, 4  ;;  %s179_s24 = int_to_ptr.vmem [resolvable:$true] %s178_s24 }
   0x6   : > { %p592_p3 = pnand %p447_p1, %p165_p2  ;;  %s502_s25 = scalar_lea.vmem %s179_s24, 16 }
   0x7   : > { %p503_p7 = scmp.ne.s32.totalorder %s179_s24, %s502_s25  ;;  %p510_p11 = scmp.lt.s32.totalorder %s179_s24, %s179_s24 }
   0x8   : > { %p469_p5 = pneg %p592_p3  ;;  %p511_p12 = scmp.lt.s32.totalorder %s502_s25, %s502_s25 }
   0xa   : > { %p470_p6 = pnand %p596_p4, %p469_p5  ;;  %p512_p13 = por %p511_p12, %p510_p11 }
   0xc   : > { %p504_p8 = pneg %p470_p6 }
   0xe   : > { %p505_p9 = pnand %p504_p8, %p503_p7 }
  0x10   : > { %p506_p10 = pneg %p505_p9 }
  0x12   : > { %p513_p0 = pnand %p512_p13, %p506_p10 }
  0x14   : > { %516 = shalt.err (!%p513_p0)
}
  0x15   : > { %s545_s26 = smov [#allocation2]   ;;  %221 = sbr.rel (%p592_p3) target bundleno = 113 (0x71), region = 36 }
  0x16   : > { %472 = dma.vmem_to_smem (!%p470_p6), %s179_s24, 16, %s545_s26, [#allocation3]  }
  0x1c   : > { %530 = dma.done.wait (%p596_p4), [#allocation3], 16  }
  0x1d   : > { %532 = vsyncadd (%p596_p4), [#allocation3], 4294967280 }
  0x1e   : > { %227 = sfence }
  0x1f   : > { %s296_s27 = sld [smem:[#allocation2]]  ;;  %s456_s28 = sld [smem:[#allocation2 + $0x1]] }
  0x20   : > { %s457_s29 = sld [smem:[#allocation2 + $0x2]]  ;;  %p267_p1 = scmp.lt.s32.totalorder %s535_s15, 1 }
  0x22   : > { %s648_s15 = smov (!%p267_p1, %s535_s15), 1 }
  0x23   : > { %s452_s7 = sshll.u32 %s648_s15, 3  ;;  %s462_s14 = smul.u32 24, %s648_s15 }
  0x24   : > { %s273_s10 = scalar_lea.vmem %s637_s1, %s452_s7  ;;  %s280_s13 = scalar_lea.vmem %s638_s2, %s452_s7 }
  0x25   : > { %s299_s30 = sadd.f32 %s456_s28, %s296_s27  ;;  %s287_s21 = scalar_lea.vmem %s639_s3, %s452_s7  ;;  %v305_v2 = vld [vmem:[%s273_s10] sm:$0xff] }
  0x26   : > { %v310_v3 = vld [vmem:[%s280_s13] sm:$0xff] }
  0x27   : > { %s300_s5 = sadd.f32 %s457_s29, %s299_s30  ;;  %s295_s30 = scalar_lea.vmem %s640_s4, %s462_s14  ;;  %v316_v5 = vld [vmem:[%s287_s21] sm:$0xff] }
  0x29   : > { %s301_s6 = sadd.f32 0.0001, %s300_s5 }
  0x2b   : > { %v302_v0 = vstv %s301_s6 }
  0x2c   : > { %500 = vrcp.f32 %v302_v0 }
  0x36   : > { %v501_v1 = vpop.eup %500 }
  0x37   : > { %463 = vpush %v501_v1 }
  0x68   : > { %s464_s22 = spop %463 }
  0x69   : > { %s306_s23 = smul.f32 %s464_s22, %s296_s27 }
  0x6a   : > { %s311_s24 = smul.f32 %s464_s22, %s456_s28 }
  0x6b   : > { %v307_v4 = vstv %s306_s23  ;;  %s317_s5 = smul.f32 %s464_s22, %s457_s29 }
  0x6c   : > { %v308_v6 = vmul.f32 %v307_v4, %v305_v2  ;;  %v312_v7 = vstv %s311_s24 }
  0x6d   : > { %v313_v8 = vmul.f32 %v312_v7, %v310_v3  ;;  %v318_v9 = vstv %s317_s5 }
  0x6e   : > { %309 = vst [vmem:[%s295_s30] sm:$0xff] %v308_v6  ;;  %v319_v10 = vmul.f32 %v318_v9, %v316_v5 }
  0x6f   : > { %458 = vst [vmem:[%s295_s30 + $0x8] sm:$0xff] %v313_v8 }
  0x70   : > { %459 = vst [vmem:[%s295_s30 + $0x10] sm:$0xff] %v319_v10 }
  0x71 PF: > { %s15_s17 = sadd.s32 1, %s543_s17   ;;  %s643_s15 = smov %s539_s16 }
  0x72   : > { %p12_p2 = scmp.ge.s32.totalorder %s15_s17, 4   ;;  %s644_s16 = smov %s646_s19 }
  0x74   :  { %14 = sbr.rel (!%p12_p2) target bundleno = 2 (0x2), region = 79 }
  0x7b   :  { %349 = vsyncpa [#allocation3], 1 }
  0x7c   :  { %351 = vsyncpa [#allocation3 + $0x1], 1 }

</bundles_post_ra>
